<compile_context>
chip_gen: v7x
topology: tpu7x:2x2x1
jax: 0.10.0
libtpu: 0.0.40
codegen_flags: <defaults>
</compile_context>

<pallas_src>
import math

import jax
import jax.numpy as jnp
from jax.experimental import pallas as pl
from jax.experimental.pallas import tpu as pltpu


def _se_kernel(x_ref, w1t_ref, b1_ref, w2t_ref, b2_ref, o_ref):
    # x_ref: (B, C, HW); weights full-size (no tiling), pre-transposed.
    x = x_ref[...]                                              # (B, C, HW)
    # Squeeze: global average pool over the spatial (lane) axis, f32 accum.
    pooled = jnp.mean(x.astype(jnp.float32), axis=-1)           # (B, C)
    # Excite: 1x1 conv (C -> Cr) + ReLU.  w1t is (C, Cr).
    h = jnp.dot(pooled, w1t_ref[...], preferred_element_type=jnp.float32)
    h = jnp.maximum(h + b1_ref[...], 0.0)                       # (B, Cr)
    # 1x1 conv (Cr -> C) + sigmoid.  w2t is (Cr, C).
    s = jnp.dot(h, w2t_ref[...], preferred_element_type=jnp.float32)
    s = jax.nn.sigmoid(s + b2_ref[...])                         # (B, C)
    # Scale: broadcast the per-channel gate over the spatial lane axis.
    # Cast the (tiny) gate to the input dtype so the big multiply stays in
    # the input precision (no full-block upcast).
    o_ref[...] = (x * s[:, :, None].astype(x.dtype)).astype(o_ref.dtype)


def _pick_block_batch(n, c, hw, itemsize, vmem_budget_bytes=32 * 1024 * 1024):
    """Largest divisor of n whose double-buffered in+out blocks fit the budget."""
    per_sample = 4 * c * hw * itemsize            # 2x in block + 2x out block
    max_b = max(1, vmem_budget_bytes // max(per_sample, 1))
    best = 1
    for cand in range(1, n + 1):
        if n % cand == 0 and cand <= max_b:
            best = cand
    return best


def se_block_pallas(x_nchw, w1, b1, w2, b2):
    """x_nchw: (N, C, H, W); w1: (Cr, C); b1: (Cr,); w2: (C, Cr); b2: (C,)."""
    N, C, H, W = x_nchw.shape
    Cr = w1.shape[0]
    HW = H * W
    itemsize = jnp.dtype(x_nchw.dtype).itemsize

    # Free reshape: NCHW -> (N, C, HW), no data movement.
    x = x_nchw.reshape(N, C, HW)
    # Pre-transpose weights once (constant-folded / hoisted by XLA).
    w1_t = jnp.transpose(w1)            # (C, Cr)
    w2_t = jnp.transpose(w2)            # (Cr, C)
    b1_2d = b1.reshape(1, Cr)
    b2_2d = b2.reshape(1, C)

    # Batch several samples per grid step (amortize ~0.35us step overhead,
    # give the MXU M > 1), capped by a conservative VMEM budget (v7x-safe).
    B = _pick_block_batch(N, C, HW, itemsize)

    cost = pl.CostEstimate(
        flops=4 * N * C * Cr + 2 * N * C * HW,
        transcendentals=N * C,
        bytes_accessed=2 * N * C * HW * itemsize + (2 * C * Cr + C + Cr) * 4,
    )

    out = pl.pallas_call(
        _se_kernel,
        out_shape=jax.ShapeDtypeStruct((N, C, HW), x.dtype),
        grid_spec=pltpu.PrefetchScalarGridSpec(
            num_scalar_prefetch=0,
            grid=(N // B,),
            in_specs=[
                pl.BlockSpec((B, C, HW), lambda n: (n, 0, 0)),
                pl.BlockSpec((C, Cr), lambda n: (0, 0)),
                pl.BlockSpec((1, Cr), lambda n: (0, 0)),
                pl.BlockSpec((Cr, C), lambda n: (0, 0)),
                pl.BlockSpec((1, C), lambda n: (0, 0)),
            ],
            out_specs=pl.BlockSpec((B, C, HW), lambda n: (n, 0, 0)),
        ),
        compiler_params=pltpu.CompilerParams(
            dimension_semantics=("parallel",),
            vmem_limit_bytes=64 * 1024 * 1024,
        ),
        cost_estimate=cost,
    )(x, w1_t, b1_2d, w2_t, b2_2d)

    # Free reshape back to NCHW.
    return out.reshape(N, C, H, W)


def se_block_ref(x_nchw, w1, b1, w2, b2):
    """Pure-JAX reference matching the PyTorch forward."""
    pooled = jnp.mean(x_nchw, axis=(2, 3))                 # (N, C)
    h = jnp.maximum(pooled @ w1.T + b1, 0.0)               # (N, Cr)
    s = jax.nn.sigmoid(h @ w2.T + b2)                      # (N, C)
    return x_nchw * s[:, :, None, None]


def init_params(key, in_channels, reduction):
    """Kaiming-normal (fan_out, relu) for the 1x1 convs, zero biases."""
    cr = in_channels // reduction
    k1, k2 = jax.random.split(key)
    # conv1: weight (cr, in_channels, 1, 1) -> fan_out = cr * 1 * 1
    std1 = math.sqrt(2.0 / cr)
    w1 = std1 * jax.random.normal(k1, (cr, in_channels), dtype=jnp.float32)
    b1 = jnp.zeros((cr,), dtype=jnp.float32)
    # conv2: weight (in_channels, cr, 1, 1) -> fan_out = in_channels
    std2 = math.sqrt(2.0 / in_channels)
    w2 = std2 * jax.random.normal(k2, (in_channels, cr), dtype=jnp.float32)
    b2 = jnp.zeros((in_channels,), dtype=jnp.float32)
    return w1, b1, w2, b2


if __name__ == "__main__":
    N, C, H, W = 2, 32, 16, 16   # in_channels=32, reduction=16 -> hidden=2
    reduction = 16

    key = jax.random.PRNGKey(0)
    kx, kp = jax.random.split(key)
    x = jax.random.normal(kx, (N, C, H, W), dtype=jnp.float32)
    w1, b1, w2, b2 = init_params(kp, C, reduction)

    out = se_block_pallas(x, w1, b1, w2, b2)
    out = jax.block_until_ready(out)

    ref = se_block_ref(x, w1, b1, w2, b2)
    assert out.shape == x.shape
    assert jnp.allclose(out, ref, atol=1e-5, rtol=1e-5)
    print("KERNEL_OK")
</pallas_src>

<mosaic_0001>
module attributes {stable_mosaic.version = 11 : i64} {
  func.func @_se_kernel(%arg0: i32, %arg1: memref<2x32x256xf32, #tpu.memory_space<vmem>>, %arg2: memref<32x2xf32, #tpu.memory_space<vmem>>, %arg3: memref<1x2xf32, #tpu.memory_space<vmem>>, %arg4: memref<2x32xf32, #tpu.memory_space<vmem>>, %arg5: memref<1x32xf32, #tpu.memory_space<vmem>>, %arg6: memref<2x32x256xf32, #tpu.memory_space<vmem>>) attributes {dimension_semantics = [#tpu.dimension_semantics<parallel>], iteration_bounds = array<i64: 1>, scalar_prefetch = 0 : i64, scratch_operands = 0 : i64, tpu.core_type = #tpu.core_type<tc>, window_params = [{transform_indices = @transform_0, window_bounds = array<i64: 2, 32, 256>}, {pipeline_mode = #tpu.pipeline_mode<synchronous>, transform_indices = @transform_1, window_bounds = array<i64: 32, 2>}, {pipeline_mode = #tpu.pipeline_mode<synchronous>, transform_indices = @transform_2, window_bounds = array<i64: 1, 2>}, {pipeline_mode = #tpu.pipeline_mode<synchronous>, transform_indices = @transform_3, window_bounds = array<i64: 2, 32>}, {pipeline_mode = #tpu.pipeline_mode<synchronous>, transform_indices = @transform_4, window_bounds = array<i64: 1, 32>}, {transform_indices = @transform_5, window_bounds = array<i64: 2, 32, 256>}]} {
    %c0 = arith.constant 0 : index
    %c0_0 = arith.constant 0 : index
    %c0_1 = arith.constant 0 : index
    %0 = vector.load %arg1[%c0, %c0_0, %c0_1] : memref<2x32x256xf32, #tpu.memory_space<vmem>>, vector<2x32x256xf32>
    %cst = arith.constant dense<0.000000e+00> : vector<2x32xf32>
    %1 = vector.multi_reduction <add>, %0, %cst [2] : vector<2x32x256xf32> to vector<2x32xf32>
    %cst_2 = arith.constant 2.560000e+02 : f32
    %2 = vector.broadcast %cst_2 : f32 to vector<2x32xf32>
    %3 = arith.divf %1, %2 : vector<2x32xf32>
    %c0_3 = arith.constant 0 : index
    %c0_4 = arith.constant 0 : index
    %4 = vector.load %arg2[%c0_3, %c0_4] : memref<32x2xf32, #tpu.memory_space<vmem>>, vector<32x2xf32>
    %cst_5 = arith.constant dense<0.000000e+00> : vector<2x2xf32>
    %5 = tpu.matmul %3, %4, %cst_5 {dimension_numbers = #tpu.dot_dimension_numbers<[1], [0], [0], [1], [0, 0, 1, 1], [], []>} : vector<2x32xf32>, vector<32x2xf32>, vector<2x2xf32> -> vector<2x2xf32>
    %c0_6 = arith.constant 0 : index
    %c0_7 = arith.constant 0 : index
    %6 = vector.load %arg3[%c0_6, %c0_7] : memref<1x2xf32, #tpu.memory_space<vmem>>, vector<1x2xf32>
    %7 = vector.broadcast %6 : vector<1x2xf32> to vector<2x2xf32>
    %8 = arith.addf %5, %7 : vector<2x2xf32>
    %cst_8 = arith.constant 0.000000e+00 : f32
    %9 = vector.broadcast %cst_8 : f32 to vector<2x2xf32>
    %10 = arith.maximumf %8, %9 : vector<2x2xf32>
    %c0_9 = arith.constant 0 : index
    %c0_10 = arith.constant 0 : index
    %11 = vector.load %arg4[%c0_9, %c0_10] : memref<2x32xf32, #tpu.memory_space<vmem>>, vector<2x32xf32>
    %cst_11 = arith.constant dense<0.000000e+00> : vector<2x32xf32>
    %12 = tpu.matmul %10, %11, %cst_11 {dimension_numbers = #tpu.dot_dimension_numbers<[1], [0], [0], [1], [0, 0, 1, 1], [], []>} : vector<2x2xf32>, vector<2x32xf32>, vector<2x32xf32> -> vector<2x32xf32>
    %c0_12 = arith.constant 0 : index
    %c0_13 = arith.constant 0 : index
    %13 = vector.load %arg5[%c0_12, %c0_13] : memref<1x32xf32, #tpu.memory_space<vmem>>, vector<1x32xf32>
    %14 = vector.broadcast %13 : vector<1x32xf32> to vector<2x32xf32>
    %15 = arith.addf %12, %14 : vector<2x32xf32>
    %16 = arith.negf %15 : vector<2x32xf32>
    %17 = math.exp %16 : vector<2x32xf32>
    %cst_14 = arith.constant 1.000000e+00 : f32
    %18 = vector.broadcast %cst_14 : f32 to vector<2x32xf32>
    %19 = arith.addf %18, %17 : vector<2x32xf32>
    %20 = arith.divf %18, %19 : vector<2x32xf32>
    %21 = vector.shape_cast %20 : vector<2x32xf32> to vector<2x32x1xf32>
    %22 = vector.broadcast %21 : vector<2x32x1xf32> to vector<2x32x256xf32>
    %23 = arith.mulf %0, %22 : vector<2x32x256xf32>
    %c0_15 = arith.constant 0 : index
    %c0_16 = arith.constant 0 : index
    %c0_17 = arith.constant 0 : index
    %24 = vector.load %arg6[%c0_15, %c0_16, %c0_17] : memref<2x32x256xf32, #tpu.memory_space<vmem>>, vector<2x32x256xf32>
    tpu.vector_store %arg6[%c0_15, %c0_16, %c0_17], %23 {strides = array<i32>} : memref<2x32x256xf32, #tpu.memory_space<vmem>>, vector<2x32x256xf32>,
    return
  }
  func.func @transform_0(%arg0: i32) -> (i32, i32, i32) {
    %c0_i32 = arith.constant 0 : i32
    %c0_i32_0 = arith.constant 0 : i32
    %c0_i32_1 = arith.constant 0 : i32
    return %arg0, %c0_i32, %c0_i32_0 : i32, i32, i32
  }
  func.func @transform_1(%arg0: i32) -> (i32, i32) {
    %c0_i32 = arith.constant 0 : i32
    %c0_i32_0 = arith.constant 0 : i32
    %c0_i32_1 = arith.constant 0 : i32
    return %c0_i32, %c0_i32_0 : i32, i32
  }
  func.func @transform_2(%arg0: i32) -> (i32, i32) {
    %c0_i32 = arith.constant 0 : i32
    %c0_i32_0 = arith.constant 0 : i32
    %c0_i32_1 = arith.constant 0 : i32
    return %c0_i32, %c0_i32_0 : i32, i32
  }
  func.func @transform_3(%arg0: i32) -> (i32, i32) {
    %c0_i32 = arith.constant 0 : i32
    %c0_i32_0 = arith.constant 0 : i32
    %c0_i32_1 = arith.constant 0 : i32
    return %c0_i32, %c0_i32_0 : i32, i32
  }
  func.func @transform_4(%arg0: i32) -> (i32, i32) {
    %c0_i32 = arith.constant 0 : i32
    %c0_i32_0 = arith.constant 0 : i32
    %c0_i32_1 = arith.constant 0 : i32
    return %c0_i32, %c0_i32_0 : i32, i32
  }
  func.func @transform_5(%arg0: i32) -> (i32, i32, i32) {
    %c0_i32 = arith.constant 0 : i32
    %c0_i32_0 = arith.constant 0 : i32
    %c0_i32_1 = arith.constant 0 : i32
    return %arg0, %c0_i32, %c0_i32_0 : i32, i32, i32
  }
}

</mosaic_0001>

<bundles_post_ra>
// kernel: tpu_custom_call.1
= control target key start
LH: loop header
LB: loop body
LE: loop exit
PB: predicated region body
PF: predicated region fallthrough
CT: control target
= control target key end

     0   :  { %10 = vsyncpa [#allocation3], 0  ;;  %s839_s0 = inlined_call_operand.hbm [shape: f32[2,32,256], index: 0, kind: input, shape index: {}]   ;;  %s840_s1 = inlined_call_operand.hbm [shape: f32[32,2], index: 1, kind: input, shape index: {}]   ;;  %s841_s2 = inlined_call_operand.hbm [shape: f32[1,2], index: 2, kind: input, shape index: {}]   ;;  %s842_s3 = inlined_call_operand.hbm [shape: f32[2,32], index: 3, kind: input, shape index: {}]   ;;  %s843_s4 = inlined_call_operand.hbm [shape: f32[1,32], index: 4, kind: input, shape index: {}]   ;;  %s844_s5 = inlined_call_operand.hbm [shape: f32[2,32,256], index: 5, kind: output, shape index: {}]  }
   0x1   :  { %11 = vsyncpa [#allocation6], 0 }
   0x2   :  { %12 = vsyncpa [#allocation9], 0 }
   0x3   :  { %13 = vsyncpa [#allocation4], 0  ;;  %s646_s18 = smov [#allocation5]   ;;  %s506_s22 = scalar_lea.hbm %s840_s1, 512 }
   0x4   :  { %s31_s19 = sshll.u32 %s646_s18, 4  ;;  %p507_p0 = scmp.ne.s32.totalorder %s840_s1, %s506_s22  ;;  %s32_s19 = int_to_ptr.vmem [resolvable:$true] %s31_s19 }
   0x5   :  { %p510_p1 = scmp.lt.u32.totalorder %s506_s22, %s840_s1 }
   0x7   :  { %p512_p2 = pnand %p510_p1, %p507_p0 }
   0x9   :  { %515 = shalt.err (!%p512_p2)
}
   0xa   :  { %s516_s27 = scalar_lea.vmem %s32_s19, 512  ;;  %p521_p4 = scmp.lt.s32.totalorder %s32_s19, %s32_s19 }
   0xb   :  { %p517_p3 = scmp.ne.s32.totalorder %s32_s19, %s516_s27  ;;  %p522_p5 = scmp.lt.s32.totalorder %s516_s27, %s516_s27 }
   0xd   :  { %p523_p6 = por %p522_p5, %p521_p4 }
   0xf   :  { %p524_p7 = pnand %p523_p6, %p517_p3 }
  0x11   :  { %527 = shalt.err (!%p524_p7)
}
  0x12   :  { %s647_s28 = smov 128   ;;  %s648_s29 = smov 8  }
  0x13   :  { %37 = dma.hbm_to_vmem [thread:$0]  %s840_s1, 512, %s32_s19, [#allocation6], %s647_s28, %s647_s28, %s648_s29  }
  0x14   :  { %s649_s7 = smov [#allocation8]   ;;  %s650_s9 = smov [#allocation2]  }
  0x15   :  { %s54_s8 = sshll.u32 %s649_s7, 4  ;;  %s19_s10 = sshll.u32 %s650_s9, 4  ;;  %s55_s8 = int_to_ptr.vmem [resolvable:$true] %s54_s8  ;;  %s20_s10 = int_to_ptr.vmem [resolvable:$true] %s19_s10 }
  0x16   :  { %s528_s13 = scalar_lea.hbm %s842_s3, 32 }
  0x17   :  { %p529_p8 = scmp.ne.s32.totalorder %s842_s3, %s528_s13  ;;  %p532_p9 = scmp.lt.u32.totalorder %s528_s13, %s842_s3 }
  0x19   :  { %p534_p10 = pnand %p532_p9, %p529_p8 }
  0x1b   :  { %537 = shalt.err (!%p534_p10)
}
  0x1c   :  { %s538_s1 = scalar_lea.vmem %s55_s8, 32  ;;  %p543_p12 = scmp.lt.s32.totalorder %s55_s8, %s55_s8 }
  0x1d   :  { %p539_p11 = scmp.ne.s32.totalorder %s55_s8, %s538_s1  ;;  %p544_p13 = scmp.lt.s32.totalorder %s538_s1, %s538_s1 }
  0x1f   :  { %p545_p0 = por %p544_p13, %p543_p12 }
  0x21   :  { %p546_p1 = pnand %p545_p0, %p539_p11 }
  0x23   :  { %549 = shalt.err (!%p546_p1)
}
  0x24   :  { %57 = dma.hbm_to_vmem [thread:$0]  %s842_s3, 32, %s55_s8, [#allocation9]  }
  0x25   :  { %s550_s22 = scalar_lea.hbm %s839_s0, 2048 }
  0x26   :  { %p551_p2 = scmp.ne.s32.totalorder %s839_s0, %s550_s22  ;;  %p554_p3 = scmp.lt.u32.totalorder %s550_s22, %s839_s0 }
  0x28   :  { %p556_p4 = pnand %p554_p3, %p551_p2 }
  0x2a   :  { %559 = shalt.err (!%p556_p4)
}
  0x2b   :  { %s560_s27 = scalar_lea.vmem %s20_s10, 2048  ;;  %p565_p6 = scmp.lt.s32.totalorder %s20_s10, %s20_s10 }
  0x2c   :  { %p561_p5 = scmp.ne.s32.totalorder %s20_s10, %s560_s27  ;;  %p566_p7 = scmp.lt.s32.totalorder %s560_s27, %s560_s27 }
  0x2e   :  { %p567_p8 = por %p566_p7, %p565_p6 }
  0x30   :  { %p568_p9 = pnand %p567_p8, %p561_p5 }
  0x32   :  { %571 = shalt.err (!%p568_p9)
}
  0x33   :  { %s651_s3 = smov 256   ;;  %s652_s28 = smov 16  }
  0x34   :  { %25 = dma.hbm_to_vmem [thread:$0]  %s839_s0, 2048, %s20_s10, [#allocation3], %s651_s3, %s651_s3, %s652_s28  }
  0x35   :  { %s653_s6 = smov [#allocation7]   ;;  %s654_s8 = smov [#allocation10]  }
  0x36   :  { %s44_s7 = sshll.u32 %s653_s6, 4  ;;  %s64_s9 = sshll.u32 %s654_s8, 4  ;;  %s45_s7 = int_to_ptr.vmem [resolvable:$true] %s44_s7  ;;  %s65_s9 = int_to_ptr.vmem [resolvable:$true] %s64_s9 }
  0x37   :  { %s572_s13 = scalar_lea.hbm %s841_s2, 16 }
  0x38   :  { %p573_p10 = scmp.ne.s32.totalorder %s841_s2, %s572_s13  ;;  %p576_p11 = scmp.lt.u32.totalorder %s572_s13, %s841_s2 }
  0x3a   :  { %p578_p12 = pnand %p576_p11, %p573_p10 }
  0x3c   :  { %581 = shalt.err (!%p578_p12)
}
  0x3d   :  { %s582_s0 = scalar_lea.vmem %s45_s7, 16  ;;  %s586_s10 = scalar_lea.vmem %s45_s7, 32 }
  0x3e   :  { %p583_p13 = scmp.ne.s32.totalorder %s45_s7, %s582_s0  ;;  %p587_p0 = scmp.lt.s32.totalorder %s45_s7, %s45_s7 }
  0x3f   :  { %p588_p1 = scmp.lt.s32.totalorder %s586_s10, %s582_s0 }
  0x41   :  { %p589_p2 = por %p588_p1, %p587_p0 }
  0x43   :  { %p590_p3 = pnand %p589_p2, %p583_p13 }
  0x45   :  { %593 = shalt.err (!%p590_p3)
}
  0x46   :  { %47 = dma.hbm_to_vmem [thread:$0]  %s841_s2, 16, %s45_s7, [#allocation6]  }
  0x47   :  { %s594_s21 = scalar_lea.hbm %s843_s4, 16 }
  0x48   :  { %p595_p4 = scmp.ne.s32.totalorder %s843_s4, %s594_s21  ;;  %p598_p5 = scmp.lt.u32.totalorder %s594_s21, %s843_s4 }
  0x4a   :  { %p600_p6 = pnand %p598_p5, %p595_p4 }
  0x4c   :  { %603 = shalt.err (!%p600_p6)
}
  0x4d   :  { %s604_s26 = scalar_lea.vmem %s65_s9, 16  ;;  %s608_s27 = scalar_lea.vmem %s65_s9, 32 }
  0x4e   :  { %p605_p7 = scmp.ne.s32.totalorder %s65_s9, %s604_s26  ;;  %p609_p8 = scmp.lt.s32.totalorder %s65_s9, %s65_s9 }
  0x4f   :  { %p610_p9 = scmp.lt.s32.totalorder %s608_s27, %s604_s26 }
  0x51   :  { %p611_p10 = por %p610_p9, %p609_p8 }
  0x53   :  { %p612_p11 = pnand %p611_p10, %p605_p7 }
  0x55   :  { %615 = shalt.err (!%p612_p11)
}
  0x56   :  { %67 = dma.hbm_to_vmem [thread:$0]  %s843_s4, 16, %s65_s9, [#allocation9]  }
  0x57   :  { %638 = dma.done.wait [#allocation3], 2048  }
  0x58   :  { %639 = vsyncadd [#allocation3], 4294965248 }
  0x59   :  { %640 = dma.done.wait [#allocation6], 528  }
  0x5a   :  { %641 = vsyncadd [#allocation6], 4294966768 }
  0x5b   :  { %642 = dma.done.wait [#allocation9], 48  }
  0x5c   :  { %643 = vsyncadd [#allocation9], 4294967248  ;;  %v752_v0 = vld [vmem:[#allocation2 + $0x40] sm:$0xff]  ;;  %v754_v1 = vld [vmem:[#allocation2 + $0x48] sm:$0xff]  ;;  %v655_v27 = vmov 0.0|0.0   ;;  %vm656_vm0 = vmmov 0   ;;  %v151_v32 = vlaneseq }
  0x5d   :  { %v756_v2 = vld [vmem:[#allocation2] sm:$0xff]  ;;  %v111_v3 = vadd.f32 %v754_v1, %v752_v0  ;;  %v760_v4 = vld [vmem:[#allocation2 + $0x8] sm:$0xff]  ;;  %v762_v5 = vld [vmem:[#allocation2 + $0x50] sm:$0xff]  ;;  %483 = vmatprep.subr.bf16.mxu0 %v655_v27  ;;  %v657_v31 = vmov 0.0   ;;  %vm162_vm1 = vcmask 130112   ;;  %vm169_vm2 = vcmask 195712  }
  0x5e   :  { %v764_v6 = vld [vmem:[#allocation2 + $0x58] sm:$0xff]  ;;  %v99_v7 = vadd.f32 %v760_v4, %v756_v2  ;;  %v768_v8 = vld [vmem:[#allocation2 + $0x10] sm:$0xff]  ;;  %v776_v12 = vld [vmem:[#allocation2 + $0x60] sm:$0xff]  ;;  %475 = vmatprep.mubr.msk.f32.mxu0 %vm656_vm0, %v657_v31  ;;  %478 = vmatprep.subr.mxu1 %v657_v31  ;;  %v152_v34 = vand.u32 127, %v151_v32  ;;  %v800_v39 = vshrl.u32 %v151_v32, 7  ;;  %vm176_vm3 = vcmask 261312  }
  0x5f   :  { %v770_v9 = vld [vmem:[#allocation2 + $0x18] sm:$0xff]  ;;  %112 = vadd.xlane.f32.xlu1 %v111_v3  ;;  %v114_v10 = vadd.f32 %v764_v6, %v762_v5  ;;  %v778_v13 = vld [vmem:[#allocation2 + $0x68] sm:$0xff]  ;;  %v780_v14 = vld [vmem:[#allocation2 + $0x20] sm:$0xff]  ;;  %480 = vmatprep.mubr.msk.f32.mxu1 %vm656_vm0, %v657_v31  ;;  %vm197_vm4 = vcmask 1041409   ;;  %vm199_vm5 = vcmask 261120   ;;  %vm285_vm6 = vcmask 1041408  }
  0x60   :  { %100 = vadd.xlane.f32.xlu0 %v99_v7  ;;  %v102_v11 = vadd.f32 %v770_v9, %v768_v8  ;;  %v782_v15 = vld [vmem:[#allocation2 + $0x28] sm:$0xff]  ;;  %v117_v16 = vadd.f32 %v778_v13, %v776_v12  ;;  %v788_v18 = vld [vmem:[#allocation2 + $0x70] sm:$0xff]  ;;  %v790_v19 = vld [vmem:[#allocation2 + $0x78] sm:$0xff]  ;;  %v157_v36 = vadd.s32 4294967288, %v152_v34  ;;  %v164_v38 = vadd.s32 4294967280, %v152_v34  ;;  %s658_s4 = smov [#allocation11]  }
  0x61   :  { %v105_v17 = vadd.f32 %v782_v15, %v780_v14  ;;  %v792_v20 = vld [vmem:[#allocation2 + $0x30] sm:$0xff]  ;;  %v794_v21 = vld [vmem:[#allocation2 + $0x38] sm:$0xff]  ;;  %v120_v22 = vadd.f32 %v790_v19, %v788_v18  ;;  %v132_v24 = vld [vmem:[#allocation5] sm:$0xff]  ;;  %v171_v43 = vadd.s32 4294967272, %v152_v34  ;;  %v155_v47 = vsub.s32 %v152_v34, %v800_v39  ;;  %s440_s30 = sshll.u32 %s658_s4, 4  ;;  %s441_s30 = int_to_ptr.vmem [resolvable:$true] %s440_s30 }
  0x62   :  { %v108_v23 = vadd.f32 %v794_v21, %v792_v20  ;;  %v133_v25 = vld [vmem:[#allocation5 + $0x8] sm:$0xff]  ;;  %v134_v28 = vld [vmem:[#allocation5 + $0x10] sm:$0xff]  ;;  %v135_v29 = vld [vmem:[#allocation5 + $0x18] sm:$0xff]  ;;  %v160_v41 = vsub.s32 %v157_v36, %v800_v39  ;;  %v167_v45 = vsub.s32 %v164_v38, %v800_v39  ;;  %vm281_vm7 = vcmask 15360   ;;  %s616_s6 = scalar_lea.vmem %s441_s30, 2048  ;;  %p621_p13 = scmp.lt.s32.totalorder %s441_s30, %s441_s30 }
  0x63   :  { %115 = vadd.xlane.f32.xlu1 %v114_v10  ;;  %v484_v26 = vpack.c.bf16 %v133_v25, %v132_v24  ;;  %v487_v30 = vpack.c.bf16 %v135_v29, %v134_v28  ;;  %v174_v54 = vsub.s32 %v171_v43, %v800_v39  ;;  %v273_v25 = vld [vmem:[#allocation8] sm:$0x3]  ;;  %v456_v31 = vld [vmem:[#allocation10] ss:$0 sm:$0xff]  ;;  %v367_v38 = vsub.s32 0, %v800_v39  ;;  %p617_p12 = scmp.ne.s32.totalorder %s441_s30, %s616_s6  ;;  %p622_p0 = scmp.lt.s32.totalorder %s616_s6, %s616_s6 }
  0x64   :  { %103 = vadd.xlane.f32.xlu0 %v102_v11  ;;  %479 = vmatpush3.msk.msra.mxu1 %vm285_vm6, %v273_v25 }
  0x65   :  { %485 = vmatpush3.bf16.msra.mxu0 %v484_v26  ;;  %v454_v26 = vld [vmem:[#allocation7] ss:$0 sm:$0xff]  ;;  %p623_p1 = por %p622_p0, %p621_p13 }
  0x66   :  { %486 = vmatprep.subr.bf16.mxu0 %v655_v27 }
  0x67   :  { %118 = vadd.xlane.f32.xlu1 %v117_v16  ;;  %p624_p2 = pnand %p623_p1, %p617_p12 }
  0x68   :  { %106 = vadd.xlane.f32.xlu0 %v105_v17 }
  0x69   :  { %488 = vmatpush3.bf16.msra.mxu0 %v487_v30 }
  0x6b   :  { %121 = vadd.xlane.f32.xlu1 %v120_v22 }
  0x6c   :  { %109 = vadd.xlane.f32.xlu0 %v108_v23 }
  0xec   :  { %v113_v33 = vpop.xlane.xlu1 %112 }
  0xed   :  { %v101_v35 = vpop.xlane.xlu0 %100  ;;  %v128_v48 = vmul.f32 0.00390625, %v113_v33 }
  0xee   :  { %v124_v51 = vmul.f32 0.00390625, %v101_v35 }
  0xef   :  { %v181_v58 = vrot.slane %v128_v48, %v155_v47 }
  0xf0   :  { %v116_v37 = vpop.xlane.xlu1 %115  ;;  %v156_v62 = vrot.slane %v124_v51, %v155_v47 }
  0xf1   :  { %v104_v40 = vpop.xlane.xlu0 %103  ;;  %v129_v42 = vmul.f32 0.00390625, %v116_v37 }
  0xf2   :  { %v125_v44 = vmul.f32 0.00390625, %v104_v40 }
  0xf3   :  { %v185_v53 = vrot.slane %v129_v42, %v160_v41  ;;  %v386_v42 = vsub.s32 1, %v800_v39 }
  0xf4   :  { %v119_v46 = vpop.xlane.xlu1 %118  ;;  %v161_v55 = vrot.slane %v125_v44, %v160_v41 }
  0xf5   :  { %v130_v49 = vmul.f32 0.00390625, %v119_v46  ;;  %v107_v50 = vpop.xlane.xlu0 %106  ;;  %v186_v3 = vsel %vm162_vm1, %v185_v53, %v181_v58 }
  0xf6   :  { %v126_v52 = vmul.f32 0.00390625, %v107_v50  ;;  %v163_v10 = vsel %vm162_vm1, %v161_v55, %v156_v62 }
  0xf7   :  { %v190_v56 = vrot.slane %v130_v49, %v167_v45 }
  0xf8   :  { %v122_v57 = vpop.xlane.xlu1 %121  ;;  %v168_v59 = vrot.slane %v126_v52, %v167_v45 }
  0xf9   :  { %v131_v60 = vmul.f32 0.00390625, %v122_v57  ;;  %v110_v61 = vpop.xlane.xlu0 %109  ;;  %v191_v11 = vsel %vm169_vm2, %v190_v56, %v186_v3 }
  0xfa   :  { %v127_v63 = vmul.f32 0.00390625, %v110_v61  ;;  %v170_v17 = vsel %vm169_vm2, %v168_v59, %v163_v10 }
  0xfb   :  { %v195_v7 = vrot.slane %v131_v60, %v174_v54 }
  0xfc   :  { %v175_v16 = vrot.slane %v127_v63, %v174_v54 }
  0xfd   :  { %v196_v22 = vsel %vm176_vm3, %v195_v7, %v191_v11 }
  0xfe   :  { %v177_v23 = vsel %vm176_vm3, %v175_v16, %v170_v17 }
  0xff   :  { %v198_v24 = vsel %vm197_vm4, %v196_v22, %v177_v23 }
 0x100   :  { %476 = vmatmul.mubr.msk.f32.vlgmr.msra.gmra.mrb[0].mxu0 %vm199_vm5, %v198_v24 }
 0x1d3   :  { %v268_v27 = vpop.f32.mrb[0].mxu0 }
 0x1d4   :  { %v269_v28 = vadd.f32 %v454_v26, %v268_v27  ;;  %v477_v29 = vpop.f32.mrb[1].mxu0 }
 0x1d6   :  { %v272_v30 = vmax.f32 %v269_v28, 0.0 }
 0x1d8   :  { %481 = vmatmul.mubr.msk.f32.vlgmr.msra.gmra.mrb[0].mxu1 %vm281_vm7, %v272_v30 }
 0x2ab   :  { %v355_v32 = vpop.f32.mrb[0].mxu1 }
 0x2ac   :  { %v356_v33 = vadd.f32 %v456_v31, %v355_v32  ;;  %v482_v34 = vpop.f32.mrb[1].mxu1 }
 0x2ae   :  { %v459_v35 = vmul.f32 -1.442695, %v356_v33 }
 0x2b0   :  { %502 = vpow2.f32 %v459_v35 }
 0x2ba   :  { %v503_v36 = vpop.eup %502 }
 0x2bb   :  { %v362_v37 = vadd.f32 1.0, %v503_v36 }
 0x2bd   :  { %504 = vrcp.f32 %v362_v37 }
 0x2c7   :  { %v505_v40 = vpop.eup %504 }
 0x2c8   :  { %v368_v41 = vrot.slane %v505_v40, %v367_v38  ;;  %v387_v43 = vrot.slane %v505_v40, %v386_v42 }
 0x2ca   :  { %374 = vbcast.lane.b32.xlu1 %v368_v41, 264  ;;  %370 = vbcast.lane.b32.xlu0 %v368_v41, 256 }
 0x2ce   :  { %378 = vbcast.lane.b32.xlu1 %v368_v41, 272  ;;  %389 = vbcast.lane.b32.xlu0 %v387_v43, 256 }
 0x2d2   :  { %382 = vbcast.lane.b32.xlu1 %v368_v41, 280  ;;  %397 = vbcast.lane.b32.xlu0 %v387_v43, 272 }
 0x2d6   :  { %393 = vbcast.lane.b32.xlu1 %v387_v43, 264 }
 0x2da   :  { %401 = vbcast.lane.b32.xlu1 %v387_v43, 280 }
 0x33c   :  { %v375_v44 = vpop.permute.xlu1 %374  ;;  %v371_v45 = vpop.permute.xlu0 %370 }
 0x33d   :  { %v405_v46 = vmul.f32 %v375_v44, %v768_v8  ;;  %v406_v47 = vmul.f32 %v375_v44, %v770_v9  ;;  %v403_v48 = vmul.f32 %v371_v45, %v756_v2  ;;  %v404_v49 = vmul.f32 %v371_v45, %v760_v4 }
 0x33f   :  { %421 = vst [vmem:[#allocation11 + $0x10] sm:$0xff] %v405_v46  ;;  %422 = vst [vmem:[#allocation11 + $0x18] sm:$0xff] %v406_v47 }
 0x340   :  { %419 = vst [vmem:[#allocation11] sm:$0xff] %v403_v48  ;;  %420 = vst [vmem:[#allocation11 + $0x8] sm:$0xff] %v404_v49  ;;  %v379_v39 = vpop.permute.xlu1 %378  ;;  %v390_v50 = vpop.permute.xlu0 %389 }
 0x341   :  { %v407_v51 = vmul.f32 %v379_v39, %v780_v14  ;;  %v408_v52 = vmul.f32 %v379_v39, %v782_v15  ;;  %v411_v53 = vmul.f32 %v390_v50, %v752_v0  ;;  %v412_v8 = vmul.f32 %v390_v50, %v754_v1 }
 0x343   :  { %423 = vst [vmem:[#allocation11 + $0x20] sm:$0xff] %v407_v51  ;;  %424 = vst [vmem:[#allocation11 + $0x28] sm:$0xff] %v408_v52 }
 0x344   :  { %427 = vst [vmem:[#allocation11 + $0x40] sm:$0xff] %v411_v53  ;;  %428 = vst [vmem:[#allocation11 + $0x48] sm:$0xff] %v412_v8  ;;  %v383_v2 = vpop.permute.xlu1 %382  ;;  %v398_v4 = vpop.permute.xlu0 %397 }
 0x345   :  { %v409_v9 = vmul.f32 %v383_v2, %v792_v20  ;;  %v410_v54 = vmul.f32 %v383_v2, %v794_v21  ;;  %v415_v55 = vmul.f32 %v398_v4, %v776_v12  ;;  %v416_v14 = vmul.f32 %v398_v4, %v778_v13 }
 0x347   :  { %425 = vst [vmem:[#allocation11 + $0x30] sm:$0xff] %v409_v9  ;;  %426 = vst [vmem:[#allocation11 + $0x38] sm:$0xff] %v410_v54 }
 0x348   :  { %431 = vst [vmem:[#allocation11 + $0x60] sm:$0xff] %v415_v55  ;;  %432 = vst [vmem:[#allocation11 + $0x68] sm:$0xff] %v416_v14  ;;  %v394_v0 = vpop.permute.xlu1 %393 }
 0x349   :  { %v413_v1 = vmul.f32 %v394_v0, %v762_v5  ;;  %v414_v15 = vmul.f32 %v394_v0, %v764_v6 }
 0x34b   :  { %429 = vst [vmem:[#allocation11 + $0x50] sm:$0xff] %v413_v1  ;;  %430 = vst [vmem:[#allocation11 + $0x58] sm:$0xff] %v414_v15 }
 0x34c   :  { %v402_v20 = vpop.permute.xlu1 %401 }
 0x34d   :  { %v417_v21 = vmul.f32 %v402_v20, %v788_v18  ;;  %v418_v12 = vmul.f32 %v402_v20, %v790_v19 }
 0x34f   :  { %433 = vst [vmem:[#allocation11 + $0x70] sm:$0xff] %v417_v21  ;;  %434 = vst [vmem:[#allocation11 + $0x78] sm:$0xff] %v418_v12 }
 0x350   :  { %627 = shalt.err (!%p624_p2)
}
 0x351   :  { %s628_s9 = scalar_lea.hbm %s844_s5, 2048 }
 0x352   :  { %p629_p3 = scmp.ne.s32.totalorder %s844_s5, %s628_s9  ;;  %p632_p4 = scmp.lt.u32.totalorder %s628_s9, %s844_s5 }
 0x354   :  { %p634_p5 = pnand %p632_p4, %p629_p3 }
 0x356   :  { %637 = shalt.err (!%p634_p5)
}
 0x357   :  { %446 = dma.vmem_to_hbm [thread:$0]  %s441_s30, 2048, %s844_s5, [#allocation4], %s651_s3, %s651_s3, %s652_s28  }
 0x358   :  { %644 = dma.done.wait [#allocation4], 2048  }
 0x359   :  { %645 = vsyncadd [#allocation4], 4294965248 }
 0x35a   :  { %450 = vsyncpa [#allocation3], 1 }
 0x35b   :  { %451 = vsyncpa [#allocation6], 1 }
 0x35c   :  { %452 = vsyncpa [#allocation9], 1 }
 0x35d   :  { %453 = vsyncpa [#allocation4], 1 }

</bundles_post_ra>
